<compile_context>
chip_gen: v6e
topology: v6e:2x2x1
jax: 0.10.0
libtpu: 0.0.40
codegen_flags: <defaults>
</compile_context>

<pallas_src>
import functools

import jax
import jax.numpy as jnp
from jax.experimental import pallas as pl
from jax.experimental.pallas import tpu as pltpu


def _linear_bias_kernel(x_ref, w_ref, b_ref, o_ref):
    """One (tm, tn) output tile: o = x @ W + b, f32 accumulation on the MXU."""
    o_ref[...] = (
        jnp.dot(x_ref[...], w_ref[...], preferred_element_type=jnp.float32)
        + b_ref[...]
    ).astype(o_ref.dtype)


def _pick_tiles(M, K, N, in_bytes, out_bytes, vmem_budget=28 << 20):
    """Choose (tm, tn) and report the double-buffered VMEM footprint."""
    # tm: full M when small, else 256 (multiple of 8/16/32 -> legal for any dtype).
    tm = M if M <= 256 else 256

    def usage(tn):
        # x tile + W tile (double-buffered inputs) + out tile (double-buffered).
        return 2 * (tm * K + K * tn) * in_bytes + 2 * tm * tn * out_bytes

    # Prefer tn = N (weight pinned in VMEM, DMA'd once); otherwise fall back to
    # smaller 128-multiples to respect the VMEM budget and keep stores lane-dense.
    if N % 128 == 0:
        candidates = [N] + [t for t in (2048, 1024, 512, 256, 128) if t < N]
    else:
        # Swin MLP N = 4*dim is a multiple of 128 for standard dims; otherwise
        # the only always-legal block width is the full dimension.
        candidates = [N]

    tn = candidates[-1]
    for c in candidates:
        if usage(c) <= vmem_budget:
            tn = c
            break
    return tm, tn, usage(tn)


@functools.partial(jax.jit, static_argnames=("tm", "tn"))
def swinv2_output_reverse(hidden_states, weight_t, bias, *, tm=None, tn=None):
    """hidden_states: (B, L, dim); weight_t: (dim, out_dim) = PyTorch weight.T;
    bias: (out_dim,).  Returns (B, L, out_dim)."""
    B, L, dim = hidden_states.shape
    out_dim = weight_t.shape[1]
    M, K, N = B * L, dim, out_dim

    in_bytes = hidden_states.dtype.itemsize
    out_bytes = hidden_states.dtype.itemsize
    auto_tm, auto_tn, vmem_used = _pick_tiles(M, K, N, in_bytes, out_bytes)
    tm = tm or auto_tm
    tn = tn or auto_tn

    x2d = hidden_states.reshape(M, K)
    b2d = bias.reshape(1, N)

    grid = (pl.cdiv(M, tm), pl.cdiv(N, tn))

    cost = pl.CostEstimate(
        flops=2 * M * K * N,
        transcendentals=0,
        bytes_accessed=x2d.size * in_bytes
        + weight_t.size * weight_t.dtype.itemsize
        + bias.size * bias.dtype.itemsize
        + M * N * out_bytes,
    )

    # Explicit scoped-VMEM limit derived from the block footprint (+4 MiB
    # headroom), capped at 32 MiB so it is safe even on v7x's 64 MiB VMEM.
    vmem_limit = int(min(32 << 20, max(16 << 20, vmem_used + (4 << 20))))

    out2d = pl.pallas_call(
        _linear_bias_kernel,
        out_shape=jax.ShapeDtypeStruct((M, N), hidden_states.dtype),
        grid=grid,
        in_specs=[
            pl.BlockSpec((tm, K), lambda i, j: (i, 0)),   # x tile (K never tiled)
            pl.BlockSpec((K, tn), lambda i, j: (0, j)),   # W tile (resident if tn==N)
            pl.BlockSpec((1, tn), lambda i, j: (0, j)),   # bias tile
        ],
        out_specs=pl.BlockSpec((tm, tn), lambda i, j: (i, j)),
        compiler_params=pltpu.CompilerParams(
            dimension_semantics=("parallel", "parallel"),
            vmem_limit_bytes=vmem_limit,
        ),
        cost_estimate=cost,
    )(x2d, weight_t, b2d)

    # TODO(synk): dropout omitted — identity in eval mode / hidden_dropout_prob=0.
    return out2d.reshape(B, L, N)


def _reference(hidden_states, weight, bias):
    return hidden_states @ weight.T + bias


if __name__ == "__main__":
    key = jax.random.PRNGKey(0)

    # --- small config implied by the module: dim=32, mlp_ratio=4 -> out_dim=128
    batch, seq, dim = 2, 8, 32
    mlp_ratio = 4.0
    out_dim = int(mlp_ratio * dim)  # 128

    kx, kw, kb = jax.random.split(key, 3)
    hidden_states = jax.random.normal(kx, (batch, seq, dim), dtype=jnp.float32)
    # nn.Linear(dim, out_dim): weight (out_dim, dim), bias (out_dim,)
    weight = jax.random.normal(kw, (out_dim, dim), dtype=jnp.float32) * 0.02
    bias = jax.random.normal(kb, (out_dim,), dtype=jnp.float32) * 0.02

    out = swinv2_output_reverse(hidden_states, weight.T, bias)
    out = jax.block_until_ready(out)
    ref = _reference(hidden_states, weight, bias)
    assert out.shape == (batch, seq, out_dim)
    assert jnp.allclose(out, ref, atol=1e-5, rtol=1e-5)

    # --- second shape exercising the tiled path (grid M extent > 1)
    batch2, seq2, dim2 = 2, 512, 64
    out_dim2 = int(mlp_ratio * dim2)  # 256
    kx2, kw2, kb2 = jax.random.split(jax.random.PRNGKey(1), 3)
    hs2 = jax.random.normal(kx2, (batch2, seq2, dim2), dtype=jnp.float32)
    w2 = jax.random.normal(kw2, (out_dim2, dim2), dtype=jnp.float32) * 0.02
    b2 = jax.random.normal(kb2, (out_dim2,), dtype=jnp.float32) * 0.02

    out2 = swinv2_output_reverse(hs2, w2.T, b2)
    out2 = jax.block_until_ready(out2)
    ref2 = _reference(hs2, w2, b2)
    assert out2.shape == (batch2, seq2, out_dim2)
    assert jnp.allclose(out2, ref2, atol=1e-4, rtol=1e-4)

    print("KERNEL_OK")
</pallas_src>

<mosaic_0001>
module attributes {stable_mosaic.version = 11 : i64} {
  func.func @_linear_bias_kernel(%arg0: i32, %arg1: i32, %arg2: memref<16x32xf32, #tpu.memory_space<vmem>>, %arg3: memref<32x128xf32, #tpu.memory_space<vmem>>, %arg4: memref<1x128xf32, #tpu.memory_space<vmem>>, %arg5: memref<16x128xf32, #tpu.memory_space<vmem>>) attributes {dimension_semantics = [#tpu.dimension_semantics<parallel>, #tpu.dimension_semantics<parallel>], iteration_bounds = array<i64: 1, 1>, scalar_prefetch = 0 : i64, scratch_operands = 0 : i64, tpu.core_type = #tpu.core_type<tc>, window_params = [{transform_indices = @transform_0, window_bounds = array<i64: 16, 32>}, {transform_indices = @transform_1, window_bounds = array<i64: 32, 128>}, {transform_indices = @transform_2, window_bounds = array<i64: 1, 128>}, {transform_indices = @transform_3, window_bounds = array<i64: 16, 128>}]} {
    %c0 = arith.constant 0 : index
    %c0_0 = arith.constant 0 : index
    %0 = vector.load %arg2[%c0, %c0_0] : memref<16x32xf32, #tpu.memory_space<vmem>>, vector<16x32xf32>
    %c0_1 = arith.constant 0 : index
    %c0_2 = arith.constant 0 : index
    %1 = vector.load %arg3[%c0_1, %c0_2] : memref<32x128xf32, #tpu.memory_space<vmem>>, vector<32x128xf32>
    %cst = arith.constant dense<0.000000e+00> : vector<16x128xf32>
    %2 = tpu.matmul %0, %1, %cst {dimension_numbers = #tpu.dot_dimension_numbers<[1], [0], [0], [1], [0, 0, 1, 1], [], []>} : vector<16x32xf32>, vector<32x128xf32>, vector<16x128xf32> -> vector<16x128xf32>
    %c0_3 = arith.constant 0 : index
    %c0_4 = arith.constant 0 : index
    %3 = vector.load %arg4[%c0_3, %c0_4] : memref<1x128xf32, #tpu.memory_space<vmem>>, vector<1x128xf32>
    %4 = vector.broadcast %3 : vector<1x128xf32> to vector<16x128xf32>
    %5 = arith.addf %2, %4 : vector<16x128xf32>
    %c0_5 = arith.constant 0 : index
    %c0_6 = arith.constant 0 : index
    %6 = vector.load %arg5[%c0_5, %c0_6] : memref<16x128xf32, #tpu.memory_space<vmem>>, vector<16x128xf32>
    tpu.vector_store %arg5[%c0_5, %c0_6], %5 {strides = array<i32>} : memref<16x128xf32, #tpu.memory_space<vmem>>, vector<16x128xf32>,
    return
  }
  func.func @transform_0(%arg0: i32, %arg1: i32) -> (i32, i32) {
    %c0_i32 = arith.constant 0 : i32
    %c0_i32_0 = arith.constant 0 : i32
    return %arg0, %c0_i32 : i32, i32
  }
  func.func @transform_1(%arg0: i32, %arg1: i32) -> (i32, i32) {
    %c0_i32 = arith.constant 0 : i32
    %c0_i32_0 = arith.constant 0 : i32
    return %c0_i32, %arg1 : i32, i32
  }
  func.func @transform_2(%arg0: i32, %arg1: i32) -> (i32, i32) {
    %c0_i32 = arith.constant 0 : i32
    %c0_i32_0 = arith.constant 0 : i32
    return %c0_i32, %arg1 : i32, i32
  }
  func.func @transform_3(%arg0: i32, %arg1: i32) -> (i32, i32) {
    %c0_i32 = arith.constant 0 : i32
    return %arg0, %arg1 : i32, i32
  }
}

</mosaic_0001>

<bundles_post_ra>
// kernel: swinv2_output_reverse.1
= control target key start
LH: loop header
LB: loop body
LE: loop exit
PB: predicated region body
PF: predicated region fallthrough
CT: control target
= control target key end

     0   :  { %8 = vsyncpa [#allocation3], 0  ;;  %s297_s0 = inlined_call_operand.hbm [shape: f32[16,32], index: 0, kind: input, shape index: {}]   ;;  %s298_s1 = inlined_call_operand.hbm [shape: f32[32,128], index: 1, kind: input, shape index: {}]   ;;  %s299_s2 = inlined_call_operand.vmem [shape: f32[1,128], index: 2, kind: input, shape index: {}]   ;;  %s300_s3 = inlined_call_operand.hbm [shape: f32[16,128], index: 3, kind: output, shape index: {}]  }
   0x1   :  { %9 = vsyncpa [#allocation6], 0 }
   0x2   :  { %10 = vsyncpa [#allocation4], 0  ;;  %s249_s12 = smov [#allocation2]  }
   0x3   :  { %s16_s13 = sshll.u32 %s249_s12, 4  ;;  %s17_s13 = int_to_ptr.vmem [resolvable:$true] %s16_s13 }
   0x4   :  { %s191_s14 = scalar_lea.vmem %s17_s13, 256  ;;  %p196_p1 = scmp.lt.s32.totalorder %s17_s13, %s17_s13 }
   0x5   :  { %p192_p0 = scmp.ne.s32.totalorder %s17_s13, %s191_s14  ;;  %p197_p2 = scmp.lt.s32.totalorder %s191_s14, %s191_s14 }
   0x7   :  { %p198_p3 = por %p197_p2, %p196_p1 }
   0x9   :  { %p199_p4 = pnand %p198_p3, %p192_p0 }
   0xb   :  { %202 = shalt.err (!%p199_p4)
}
   0xc   :  { %s250_s15 = smov 128   ;;  %s251_s16 = smov 8  }
   0xd   :  { %22 = dma.hbm_to_vmem [thread:$0]  %s297_s0, 256, %s17_s13, [#allocation3], %s250_s15, %s250_s15, %s251_s16  }
   0xe   :  { %s252_s19 = smov [#allocation5]  }
   0xf   :  { %s28_s20 = sshll.u32 %s252_s19, 4  ;;  %s29_s20 = int_to_ptr.vmem [resolvable:$true] %s28_s20 }
  0x10   :  { %s211_s21 = scalar_lea.vmem %s29_s20, 512  ;;  %p216_p6 = scmp.lt.s32.totalorder %s29_s20, %s29_s20 }
  0x11   :  { %p212_p5 = scmp.ne.s32.totalorder %s29_s20, %s211_s21  ;;  %p217_p7 = scmp.lt.s32.totalorder %s211_s21, %s211_s21 }
  0x13   :  { %p218_p8 = por %p217_p7, %p216_p6 }
  0x15   :  { %p219_p9 = pnand %p218_p8, %p212_p5 }
  0x17   :  { %222 = shalt.err (!%p219_p9)
}
  0x18   :  { %34 = dma.hbm_to_vmem [thread:$0]  %s298_s1, 512, %s29_s20, [#allocation6], %s250_s15, %s250_s15, %s251_s16  }
  0x19   :  { %243 = dma.done.wait [#allocation3], 256  }
  0x1a   :  { %244 = vsyncadd [#allocation3], 4294967040 }
  0x1b   :  { %245 = dma.done.wait [#allocation6], 512  }
  0x1c   :  { %246 = vsyncadd [#allocation6], 4294966784  ;;  %vm56_vm0 = vcmask 261120   ;;  %v48_v0 = vld [vmem:[#allocation5 + $0x18] sm:$0xff]  ;;  %v47_v1 = vld [vmem:[#allocation5 + $0x10] sm:$0xff]  ;;  %s253_s24 = smov [#allocation7]  }
  0x1d   :  { %167 = vmatprep.subr.mxu0 %v48_v0  ;;  %v43_v2 = vld [vmem:[#allocation2] sm:$0xff]  ;;  %v46_v3 = vld [vmem:[#allocation5 + $0x8] sm:$0xff]  ;;  %v45_v4 = vld [vmem:[#allocation5] sm:$0xff]  ;;  %s145_s25 = sshll.u32 %s253_s24, 4  ;;  %s146_s25 = int_to_ptr.vmem [resolvable:$true] %s145_s25 }
  0x1e   :  { %168 = vmatpush3.msra.mxu0 %v48_v0  ;;  %175 = vmatprep.mubr.msk.f32.mxu0 %vm56_vm0, %v43_v2  ;;  %v44_v5 = vld [vmem:[#allocation2 + $0x8] sm:$0xff]  ;;  %v158_v6 = vld [vmem:[%s299_s2] ss:$0 sm:$0xff]  ;;  %s223_s26 = scalar_lea.vmem %s146_s25, 256  ;;  %p228_p11 = scmp.lt.s32.totalorder %s146_s25, %s146_s25 }
  0x1f   :  { %169 = vmatprep.subr.mxu0 %v47_v1  ;;  %p224_p10 = scmp.ne.s32.totalorder %s146_s25, %s223_s26  ;;  %p229_p12 = scmp.lt.s32.totalorder %s223_s26, %s223_s26 }
  0x20   :  { %170 = vmatpush3.msra.mxu0 %v47_v1 }
  0x21   :  { %171 = vmatprep.subr.mxu0 %v46_v3  ;;  %p230_p13 = por %p229_p12, %p228_p11 }
  0x22   :  { %172 = vmatpush3.msra.mxu0 %v46_v3 }
  0x23   :  { %173 = vmatprep.subr.mxu0 %v45_v4  ;;  %p231_p0 = pnand %p230_p13, %p224_p10 }
  0x24   :  { %174 = vmatpush3.msra.mxu0 %v45_v4 }
  0x25   :  { %176 = vmatmul.mubr.msk.f32.vlgmr.msra.gmra.mxu0 %vm56_vm0, %v44_v5 }
  0xe5   :  { %v177_v7 = vpop.f32.mrf.mxu0 }
  0xe6   :  { %v135_v8 = vadd.f32 %v177_v7, %v158_v6 }
  0xe7   :  { %v129_v9 = vpop.f32.mrf.mxu0 }
  0xe8   :  { %139 = vst [vmem:[#allocation7 + $0x8] sm:$0xff] %v135_v8  ;;  %v130_v10 = vadd.f32 %v158_v6, %v129_v9 }
  0xea   :  { %138 = vst [vmem:[#allocation7] sm:$0xff] %v130_v10 }
  0xeb   :  { %234 = shalt.err (!%p231_p0)
}
  0xec   :  { %151 = dma.vmem_to_hbm [thread:$0]  %s146_s25, 256, %s300_s3, [#allocation4], %s250_s15, %s250_s15, %s251_s16  }
  0xed   :  { %247 = dma.done.wait [#allocation4], 256  }
  0xee   :  { %248 = vsyncadd [#allocation4], 4294967040 }
  0xef   :  { %155 = vsyncpa [#allocation3], 1 }
  0xf0   :  { %156 = vsyncpa [#allocation6], 1 }
  0xf1   :  { %157 = vsyncpa [#allocation4], 1 }

</bundles_post_ra>
